<compile_context>
chip_gen: v6e
topology: v6e:2x2x1
jax: 0.10.0
libtpu: 0.0.40
codegen_flags: <defaults>
</compile_context>

<pallas_src>
import math
from functools import partial

import jax
import jax.numpy as jnp
from jax import lax
from jax.experimental import pallas as pl
from jax.experimental.pallas import tpu as pltpu


def _round_up(x, m):
    return (x + m - 1) // m * m


# Large finite mask value: avoids exp(-inf - -inf) = NaN on masked rows.
_MASK_VALUE = -0.7 * float(jnp.finfo(jnp.float32).max)


def _pick_head_group(n_heads, head_dim):
    """Heads packed per attention block so the output block's lane width is
    >= 128 where possible (full vst stores instead of masked partial stores)."""
    if n_heads * head_dim <= 128:
        return n_heads
    target = max(1, 128 // head_dim)
    for hg in range(min(target, n_heads), 0, -1):
        if n_heads % hg == 0:
            return hg
    return 1


def _split_even_odd_cols(w_t, n_heads, head_dim):
    """Permute each head's output columns to [evens..., odds...] so RoPE can be
    applied in rotate-half form (two contiguous lane halves, no interleave)."""
    perm = jnp.concatenate([jnp.arange(0, head_dim, 2),
                            jnp.arange(1, head_dim, 2)])
    full = (jnp.arange(n_heads)[:, None] * head_dim + perm[None, :]).reshape(-1)
    return w_t[:, full]


# --------------------------- tiled matmul kernel ----------------------------

def _matmul_kernel(x_ref, w_ref, o_ref, acc_ref):
    @pl.when(pl.program_id(2) == 0)
    def _init():
        acc_ref[...] = jnp.zeros_like(acc_ref)

    acc_ref[...] += jnp.dot(x_ref[...], w_ref[...],
                            preferred_element_type=jnp.float32)

    @pl.when(pl.program_id(2) == pl.num_programs(2) - 1)
    def _store():
        o_ref[...] = acc_ref[...].astype(o_ref.dtype)


class PallasLinear:
    """y = x @ w_t with an (M, N, K) accumulator grid.  The weight is padded to
    tile multiples once at construction (no per-call weight pad/copy)."""

    def __init__(self, w_t, *, tk=256, tn=512, compute_dtype=jnp.bfloat16):
        K, N = w_t.shape
        self.K, self.N = K, N
        self.tk = min(tk, _round_up(K, 128))
        self.tn = min(tn, _round_up(N, 128))
        self.Kp = _round_up(K, self.tk)
        self.Np = _round_up(N, self.tn)
        self.w = jnp.pad(
            w_t, ((0, self.Kp - K), (0, self.Np - N))).astype(compute_dtype)

    def __call__(self, x, *, out_dtype, tm=512):
        M, K = x.shape
        assert K == self.K
        tm = min(tm, _round_up(M, 8))
        Mp = _round_up(M, tm)
        if (Mp, self.Kp) != (M, K):
            x = jnp.pad(x, ((0, Mp - M), (0, self.Kp - K)))
        tk, tn = self.tk, self.tn
        out = pl.pallas_call(
            _matmul_kernel,
            out_shape=jax.ShapeDtypeStruct((Mp, self.Np), out_dtype),
            grid=(Mp // tm, self.Np // tn, self.Kp // tk),
            in_specs=[
                pl.BlockSpec((tm, tk), lambda i, j, k: (i, k)),
                pl.BlockSpec((tk, tn), lambda i, j, k: (k, j)),
            ],
            out_specs=pl.BlockSpec((tm, tn), lambda i, j, k: (i, j)),
            scratch_shapes=[pltpu.VMEM((tm, tn), jnp.float32)],
            compiler_params=pltpu.CompilerParams(
                dimension_semantics=("parallel", "parallel", "arbitrary")),
        )(x, self.w)
        if (Mp, self.Np) != (M, self.N):
            out = out[:M, :self.N]
        return out


# ------------------------- flash attention kernel ---------------------------

def _flash_attn_kernel(q_ref, k_ref, v_ref, o_ref, m_ref, l_ref, acc_ref, *,
                       kv_len, start_pos, causal, tq, tkv, hg, head_dim):
    qi = pl.program_id(2)
    ki = pl.program_id(3)

    @pl.when(ki == 0)
    def _init():
        m_ref[...] = jnp.full_like(m_ref, _MASK_VALUE)
        l_ref[...] = jnp.zeros_like(l_ref)
        acc_ref[...] = jnp.zeros_like(acc_ref)

    def _compute():
        # Causal + cache-length mask generated in-kernel (no HBM mask traffic).
        row = lax.broadcasted_iota(jnp.int32, (tq, tkv), 0) + (qi * tq + start_pos)
        col = lax.broadcasted_iota(jnp.int32, (tq, tkv), 1) + ki * tkv
        valid = col < kv_len
        if causal:
            valid = jnp.logical_and(valid, col <= row)
        for h in range(hg):                       # static, small head group
            q = q_ref[0, h]                       # (tq, D) bf16 (scale in wq)
            k = k_ref[0, h]                       # (tkv, D) bf16
            v = v_ref[0, h]                       # (tkv, D) bf16
            # QK^T on the MXU contracting D directly (no explicit transpose).
            s = lax.dot_general(q, k, (((1,), (1,)), ((), ())),
                                preferred_element_type=jnp.float32)
            s = jnp.where(valid, s, _MASK_VALUE)
            m_prev = m_ref[h]
            m_new = jnp.maximum(m_prev, jnp.max(s, axis=-1, keepdims=True))
            alpha = jnp.exp(m_prev - m_new)
            p = jnp.exp(s - m_new)
            l_ref[h] = alpha * l_ref[h] + jnp.sum(p, axis=-1, keepdims=True)
            acc_ref[h] = alpha * acc_ref[h] + jnp.dot(
                p.astype(v.dtype), v, preferred_element_type=jnp.float32)
            m_ref[h] = m_new

    if causal:
        # Block-level causal skip: tiles entirely above the diagonal do no work.
        pl.when(ki * tkv <= qi * tq + start_pos + tq - 1)(_compute)
    else:
        _compute()

    @pl.when(ki == pl.num_programs(3) - 1)
    def _finalize():
        for h in range(hg):
            inv_l = pl.reciprocal(l_ref[h], approx=True)
            o_ref[0, :, h * head_dim:(h + 1) * head_dim] = (
                acc_ref[h] * inv_l).astype(o_ref.dtype)


def flash_attention(q, k_cache, v_cache, *, kv_len, start_pos, causal,
                    tq, tkv, hg):
    """q: (B, H, s_pad, D) bf16; caches: (MB, H, seq_pad, D) bf16.
    Returns a lane-dense (B, s_pad, H*D) bf16 output (heads packed on lanes)."""
    B, H, s_pad, D = q.shape
    assert H % hg == 0
    G = H // hg
    nq = s_pad // tq
    nkv = pl.cdiv(kv_len, tkv)
    assert nkv * tkv <= k_cache.shape[2]

    kernel = partial(_flash_attn_kernel, kv_len=kv_len, start_pos=start_pos,
                     causal=causal, tq=tq, tkv=tkv, hg=hg, head_dim=D)

    q_spec = pl.BlockSpec((1, hg, tq, D), lambda b, g, i, j: (b, g, i, 0))
    out_spec = pl.BlockSpec((1, tq, hg * D), lambda b, g, i, j: (b, i, g))

    if causal:
        def kv_map(b, g, i, j):
            # Clamp to the last KV tile this q tile can see; once clamped the
            # block index repeats, so Pallas skips the (useless) DMA.
            j_max = (start_pos + (i + 1) * tq - 1) // tkv
            return (b, g, jnp.minimum(j, j_max), 0)
    else:
        def kv_map(b, g, i, j):
            return (b, g, j, 0)

    def call(kv_spec_kwargs):
        kv_spec = pl.BlockSpec((1, hg, tkv, D), kv_map, **kv_spec_kwargs)
        return pl.pallas_call(
            kernel,
            out_shape=jax.ShapeDtypeStruct((B, s_pad, H * D), q.dtype),
            grid=(B, G, nq, nkv),
            in_specs=[q_spec, kv_spec, kv_spec],
            out_specs=out_spec,
            scratch_shapes=[
                pltpu.VMEM((hg, tq, 1), jnp.float32),    # running max
                pltpu.VMEM((hg, tq, 1), jnp.float32),    # running denominator
                pltpu.VMEM((hg, tq, D), jnp.float32),    # output accumulator
            ],
            compiler_params=pltpu.CompilerParams(
                dimension_semantics=("parallel", "parallel", "parallel",
                                     "arbitrary")),
        )(q, k_cache, v_cache)

    if not causal:
        # Decode: per-tile compute is tiny, so deepen the KV pipeline to hide
        # DMA latency; fall back to default double-buffering if unsupported.
        try:
            return call(dict(pipeline_mode=pl.Buffered(3)))
        except Exception:
            pass
    return call({})


# ------------------------------ JAX glue ------------------------------------

def apply_rotary_emb_half(xq, xk, cos, sin):
    """RoPE in rotate-half form.  xq/xk: (B, S, H, D) whose per-head columns
    were pre-permuted to [evens..., odds...] (done once in the weights), so
    the rotation is two contiguous half-slices instead of an interleave."""
    # TODO(synk): fuse RoPE into the QKV projection epilogue (pltpu.roll) so
    # q/k never round-trip through HBM between projection and cache.
    def rot(x):
        xf = x.astype(jnp.float32)
        half = xf.shape[-1] // 2
        x1, x2 = xf[..., :half], xf[..., half:]
        c = cos[None, :, None, :]
        s = sin[None, :, None, :]
        return jnp.concatenate([x1 * c - x2 * s, x1 * s + x2 * c],
                               axis=-1).astype(x.dtype)

    return rot(xq), rot(xk)


def precompute_freqs(head_dim, start_pos, seqlen, theta=10000.0):
    freqs = 1.0 / (
        theta ** (jnp.arange(0, head_dim, 2, dtype=jnp.float32) / head_dim))
    t = jnp.arange(start_pos, start_pos + seqlen, dtype=jnp.float32)
    angles = jnp.outer(t, freqs)          # (S, D//2)
    return jnp.cos(angles), jnp.sin(angles)


class AttentionPallas:
    """llama Attention with Pallas TPU kernels (bf16 MXU, flash attention core)."""

    def __init__(self, dim, n_heads, max_batch_size, max_seq_len, key,
                 compute_dtype=jnp.bfloat16, q_tile=None, kv_tile=None):
        assert dim % n_heads == 0
        self.dim = dim
        self.n_local_heads = n_heads
        self.head_dim = dim // n_heads
        assert self.head_dim % 2 == 0
        self.compute_dtype = compute_dtype
        self.head_group = _pick_head_group(n_heads, self.head_dim)
        self.q_tile = q_tile if q_tile is not None else 256
        self.kv_tile = (kv_tile if kv_tile is not None
                        else min(512, _round_up(max_seq_len, 8)))
        seq_pad = _round_up(max_seq_len, self.kv_tile)

        k1, k2, k3, k4 = jax.random.split(key, 4)
        std = 1.0 / math.sqrt(dim)

        def w(k):  # nn.Linear weight is (out, in); store W.T = (in, out)
            return (jax.random.normal(k, (dim, dim), jnp.float32) * std).T

        wq_t, wk_t, wv_t, wo_t = w(k1), w(k2), w(k3), w(k4)

        # Original weights for the pure-JAX reference (PyTorch semantics).
        self.wq_ref, self.wk_ref, self.wv_ref, self.wo_ref = wq_t, wk_t, wv_t, wo_t

        # Kernel weights: even/odd-split column order for q/k (rotate-half
        # RoPE), 1/sqrt(head_dim) folded into the q columns, fused QKV,
        # pre-padded to matmul tile multiples once here.
        H, D = n_heads, self.head_dim
        wq_p = _split_even_odd_cols(wq_t, H, D) * (1.0 / math.sqrt(D))
        wk_p = _split_even_odd_cols(wk_t, H, D)
        wqkv_t = jnp.concatenate([wq_p, wk_p, wv_t], axis=1)
        self.qkv_proj = PallasLinear(wqkv_t, compute_dtype=compute_dtype)
        self.o_proj = PallasLinear(wo_t, compute_dtype=compute_dtype)

        # KV cache in attention-native (batch, heads, seq, head_dim) bf16; the
        # seq dim is padded to a KV-tile multiple so edge KV tiles always read
        # initialized memory.  K uses the even/odd-split layout.
        # TODO(synk): fp8 KV cache (per-tile scales) for v7x decode bandwidth.
        self.cache_k = jnp.zeros(
            (max_batch_size, n_heads, seq_pad, self.head_dim), compute_dtype)
        self.cache_v = jnp.zeros_like(self.cache_k)

    def __call__(self, x, start_pos, cos, sin, mask, cache_k, cache_v):
        bsz, seqlen, _ = x.shape
        H, D = self.n_local_heads, self.head_dim
        cdt = self.compute_dtype

        # Fused QKV projection; bf16 output halves activation writeback.
        x2d = x.reshape(bsz * seqlen, self.dim).astype(cdt)
        qkv = self.qkv_proj(x2d, out_dtype=cdt)             # (M, 3*dim) bf16
        xq, xk, xv = jnp.split(qkv, 3, axis=1)
        xq = xq.reshape(bsz, seqlen, H, D)
        xk = xk.reshape(bsz, seqlen, H, D)
        xv = xv.reshape(bsz, seqlen, H, D)

        # RoPE in rotate-half form (weights were pre-permuted at init).
        xq, xk = apply_rotary_emb_half(xq, xk, cos, sin)

        # Functional KV-cache update; caches are (MB, H, seq_pad, D) bf16.
        # TODO(synk): replace with an aliased Pallas writeback kernel
        # (input_output_aliases) to avoid re-materializing the cache value.
        xk_c = jnp.transpose(xk, (0, 2, 1, 3)).astype(cdt)
        xv_c = jnp.transpose(xv, (0, 2, 1, 3)).astype(cdt)
        cache_k = lax.dynamic_update_slice(cache_k, xk_c, (0, 0, start_pos, 0))
        cache_v = lax.dynamic_update_slice(cache_v, xv_c, (0, 0, start_pos, 0))

        kv_len = start_pos + seqlen

        # 1/sqrt(head_dim) is already folded into the wq columns.
        q = jnp.transpose(xq, (0, 2, 1, 3)).astype(cdt)     # (B, H, S, D)
        tq = min(self.q_tile, _round_up(seqlen, 8))
        s_pad = _round_up(seqlen, tq)
        if s_pad != seqlen:
            q = jnp.pad(q, ((0, 0), (0, 0), (0, s_pad - seqlen), (0, 0)))

        # NOTE: the llama causal mask is regenerated inside the kernel; the
        # `mask` argument only selects causal vs. full attention.
        out = flash_attention(
            q, cache_k, cache_v, kv_len=kv_len, start_pos=start_pos,
            causal=(mask is not None), tq=tq, tkv=self.kv_tile,
            hg=self.head_group)                             # (B, s_pad, H*D)

        # Lane-dense output feeds the output projection directly (no transpose).
        out = out[:, :seqlen, :].reshape(bsz * seqlen, self.dim)
        y = self.o_proj(out, out_dtype=jnp.float32)
        return y.reshape(bsz, seqlen, self.dim), cache_k, cache_v


# ------------------- reference (pure JAX, PyTorch semantics) -----------------

def _rope_interleaved(x, cos, sin):
    xf = x.astype(jnp.float32)
    xr = xf.reshape(*xf.shape[:-1], -1, 2)
    xe, xo = xr[..., 0], xr[..., 1]
    c = cos[None, :, None, :]
    s = sin[None, :, None, :]
    oe = xe * c - xo * s
    oo = xe * s + xo * c
    return jnp.stack([oe, oo], axis=-1).reshape(xf.shape)


def reference_forward(mod, x, start_pos, cos, sin, mask, cache_k, cache_v):
    """Mirrors the original PyTorch Attention.forward with the original
    (unpermuted, unscaled) weights + interleaved RoPE; mirrors bf16 casts."""
    bsz, seqlen, dim = x.shape
    H, D = mod.n_local_heads, mod.head_dim
    cdt = mod.compute_dtype
    f32 = jnp.float32
    bf = lambda v: v.astype(cdt).astype(f32)

    x2d = bf(x.reshape(-1, dim))
    xq = bf(x2d @ bf(mod.wq_ref)).reshape(bsz, seqlen, H, D)
    xk = bf(x2d @ bf(mod.wk_ref)).reshape(bsz, seqlen, H, D)
    xv = bf(x2d @ bf(mod.wv_ref)).reshape(bsz, seqlen, H, D)
    xq = _rope_interleaved(xq, cos, sin)
    xk = _rope_interleaved(xk, cos, sin)

    cache_k = lax.dynamic_update_slice(
        cache_k, jnp.transpose(xk, (0, 2, 1, 3)).astype(cdt), (0, 0, start_pos, 0))
    cache_v = lax.dynamic_update_slice(
        cache_v, jnp.transpose(xv, (0, 2, 1, 3)).astype(cdt), (0, 0, start_pos, 0))

    L = start_pos + seqlen
    keys = cache_k[:bsz, :, :L, :].astype(f32)
    values = cache_v[:bsz, :, :L, :].astype(f32)

    q = bf(jnp.transpose(xq, (0, 2, 1, 3)))
    s = jnp.einsum("bhsd,bhld->bhsl", q, keys) / math.sqrt(D)
    if mask is not None:
        s = s + mask
    m = jnp.max(s, axis=-1, keepdims=True)
    p = jnp.exp(s - m)
    l = jnp.sum(p, axis=-1, keepdims=True)
    num = jnp.einsum("bhsl,bhld->bhsd", bf(p), values)
    o = bf(num / l)
    o = jnp.transpose(o, (0, 2, 1, 3)).reshape(bsz * seqlen, dim)
    y = o @ bf(mod.wo_ref)
    return y.reshape(bsz, seqlen, dim), cache_k, cache_v


if __name__ == "__main__":
    dim, n_heads = 32, 4                    # head_dim = 8
    max_batch_size, max_seq_len = 4, 32
    bsz = 2

    key = jax.random.PRNGKey(0)
    kx1, kx2, kw = jax.random.split(key, 3)

    # q_tile=8 / kv_tile=8 force multiple q and KV tiles even at these small
    # shapes so the online-softmax accumulation AND the causal block-skip path
    # (qi=0, ki=1 is fully masked -> skipped) are actually exercised.
    mod = AttentionPallas(dim, n_heads, max_batch_size, max_seq_len, kw,
                          q_tile=8, kv_tile=8)

    # Kernel and reference keep separate cache chains: the kernel's K cache
    # uses the even/odd-split (rotate-half RoPE) column layout — an internal
    # implementation detail — so caches are validated end-to-end via step 2.
    ker_ck, ker_cv = mod.cache_k, mod.cache_v
    ref_ck, ref_cv = mod.cache_k, mod.cache_v

    # ---- step 1: prefill (seqlen=16, causal mask, start_pos=0) ----
    seqlen, start_pos = 16, 0
    x = jax.random.normal(kx1, (bsz, seqlen, dim), jnp.float32)
    cos, sin = precompute_freqs(dim // n_heads, start_pos, seqlen)
    mask = jnp.triu(
        jnp.full((seqlen, start_pos + seqlen), float("-inf"), jnp.float32),
        k=start_pos + 1)

    out1, ker_ck, ker_cv = mod(x, start_pos, cos, sin, mask, ker_ck, ker_cv)
    out1 = jax.block_until_ready(out1)
    ref1, ref_ck, ref_cv = reference_forward(mod, x, start_pos, cos, sin, mask,
                                             ref_ck, ref_cv)
    assert jnp.allclose(out1, ref1, atol=2e-2, rtol=2e-2), "prefill mismatch"

    # ---- step 2: decode (seqlen=1, mask=None, start_pos=16) ----
    seqlen2, start_pos2 = 1, 16
    x2 = jax.random.normal(kx2, (bsz, seqlen2, dim), jnp.float32)
    cos2, sin2 = precompute_freqs(dim // n_heads, start_pos2, seqlen2)

    out2, ker_ck, ker_cv = mod(x2, start_pos2, cos2, sin2, None, ker_ck, ker_cv)
    out2 = jax.block_until_ready(out2)
    ref2, ref_ck, ref_cv = reference_forward(mod, x2, start_pos2, cos2, sin2,
                                             None, ref_ck, ref_cv)
    assert jnp.allclose(out2, ref2, atol=2e-2, rtol=2e-2), "decode mismatch"

    print("KERNEL_OK")
</pallas_src>

<mosaic_0001>
module attributes {stable_mosaic.version = 11 : i64} {
  func.func @_matmul_kernel(%arg0: i32, %arg1: i32, %arg2: i32, %arg3: memref<32x128xbf16, #tpu.memory_space<vmem>>, %arg4: memref<128x128xbf16, #tpu.memory_space<vmem>>, %arg5: memref<32x128xbf16, #tpu.memory_space<vmem>>, %arg6: memref<32x128xf32, #tpu.memory_space<vmem>>) attributes {dimension_semantics = [#tpu.dimension_semantics<parallel>, #tpu.dimension_semantics<parallel>, #tpu.dimension_semantics<arbitrary>], iteration_bounds = array<i64: 1, 1, 1>, scalar_prefetch = 0 : i64, scratch_operands = 1 : i64, tpu.core_type = #tpu.core_type<tc>, window_params = [{transform_indices = @transform_0, window_bounds = array<i64: 32, 128>}, {transform_indices = @transform_1, window_bounds = array<i64: 128, 128>}, {transform_indices = @transform_2, window_bounds = array<i64: 32, 128>}]} {
    %c0_i32 = arith.constant 0 : i32
    %0 = arith.cmpi eq, %arg2, %c0_i32 : i32
    %1 = arith.extui %0 : i1 to i32
    %c0_i32_0 = arith.constant 0 : i32
    %2 = arith.cmpi ne, %1, %c0_i32_0 : i32
    scf.if %2 {
      %cst_10 = arith.constant 0.000000e+00 : f32
      %12 = vector.broadcast %cst_10 : f32 to vector<32x128xf32>
      %c0_11 = arith.constant 0 : index
      %c0_12 = arith.constant 0 : index
      %13 = vector.load %arg6[%c0_11, %c0_12] : memref<32x128xf32, #tpu.memory_space<vmem>>, vector<32x128xf32>
      tpu.vector_store %arg6[%c0_11, %c0_12], %12 {strides = array<i32>} : memref<32x128xf32, #tpu.memory_space<vmem>>, vector<32x128xf32>,
    } else {
    }
    %c0 = arith.constant 0 : index
    %c0_1 = arith.constant 0 : index
    %3 = vector.load %arg6[%c0, %c0_1] : memref<32x128xf32, #tpu.memory_space<vmem>>, vector<32x128xf32>
    %c0_2 = arith.constant 0 : index
    %c0_3 = arith.constant 0 : index
    %4 = vector.load %arg3[%c0_2, %c0_3] : memref<32x128xbf16, #tpu.memory_space<vmem>>, vector<32x128xbf16>
    %c0_4 = arith.constant 0 : index
    %c0_5 = arith.constant 0 : index
    %5 = vector.load %arg4[%c0_4, %c0_5] : memref<128x128xbf16, #tpu.memory_space<vmem>>, vector<128x128xbf16>
    %cst = arith.constant dense<0.000000e+00> : vector<32x128xf32>
    %6 = tpu.matmul %4, %5, %cst {dimension_numbers = #tpu.dot_dimension_numbers<[1], [0], [0], [1], [0, 0, 1, 1], [], []>} : vector<32x128xbf16>, vector<128x128xbf16>, vector<32x128xf32> -> vector<32x128xf32>
    %7 = arith.addf %3, %6 : vector<32x128xf32>
    %c0_6 = arith.constant 0 : index
    %c0_7 = arith.constant 0 : index
    %8 = vector.load %arg6[%c0_6, %c0_7] : memref<32x128xf32, #tpu.memory_space<vmem>>, vector<32x128xf32>
    tpu.vector_store %arg6[%c0_6, %c0_7], %7 {strides = array<i32>} : memref<32x128xf32, #tpu.memory_space<vmem>>, vector<32x128xf32>,
    %c0_i32_8 = arith.constant 0 : i32
    %9 = arith.cmpi eq, %arg2, %c0_i32_8 : i32
    %10 = arith.extui %9 : i1 to i32
    %c0_i32_9 = arith.constant 0 : i32
    %11 = arith.cmpi ne, %10, %c0_i32_9 : i32
    scf.if %11 {
      %c0_10 = arith.constant 0 : index
      %c0_11 = arith.constant 0 : index
      %12 = vector.load %arg6[%c0_10, %c0_11] : memref<32x128xf32, #tpu.memory_space<vmem>>, vector<32x128xf32>
      %13 = arith.truncf %12 : vector<32x128xf32> to vector<32x128xbf16>
      %c0_12 = arith.constant 0 : index
      %c0_13 = arith.constant 0 : index
      %14 = vector.load %arg5[%c0_12, %c0_13] : memref<32x128xbf16, #tpu.memory_space<vmem>>, vector<32x128xbf16>
      tpu.vector_store %arg5[%c0_12, %c0_13], %13 {strides = array<i32>} : memref<32x128xbf16, #tpu.memory_space<vmem>>, vector<32x128xbf16>,
    } else {
    }
    return
  }
  func.func @transform_0(%arg0: i32, %arg1: i32, %arg2: i32) -> (i32, i32) {
    %c0_i32 = arith.constant 0 : i32
    return %arg0, %arg2 : i32, i32
  }
  func.func @transform_1(%arg0: i32, %arg1: i32, %arg2: i32) -> (i32, i32) {
    %c0_i32 = arith.constant 0 : i32
    return %arg2, %arg1 : i32, i32
  }
  func.func @transform_2(%arg0: i32, %arg1: i32, %arg2: i32) -> (i32, i32) {
    %c0_i32 = arith.constant 0 : i32
    return %arg0, %arg1 : i32, i32
  }
}

</mosaic_0001>

<bundles_post_ra>
// kernel: tpu_custom_call.1
= control target key start
LH: loop header
LB: loop body
LE: loop exit
PB: predicated region body
PF: predicated region fallthrough
CT: control target
= control target key end

     0   :  { %7 = vsyncpa [#allocation4], 0  ;;  %s413_s0 = inlined_call_operand.hbm [shape: bf16[32,128], index: 0, kind: input, shape index: {}]   ;;  %s414_s1 = inlined_call_operand.hbm [shape: bf16[128,128], index: 1, kind: input, shape index: {}]   ;;  %s415_s2 = inlined_call_operand.hbm [shape: bf16[32,128], index: 2, kind: output, shape index: {}]  }
   0x1   :  { %8 = vsyncpa [#allocation7], 0 }
   0x2   :  { %9 = vsyncpa [#allocation5], 0  ;;  %s375_s9 = smov [#allocation3]  }
   0x3   :  { %s15_s10 = sshll.u32 %s375_s9, 4  ;;  %s16_s10 = int_to_ptr.vmem [resolvable:$true] %s15_s10 }
   0x4   :  { %s317_s11 = scalar_lea.vmem %s16_s10, 256  ;;  %p322_p1 = scmp.lt.s32.totalorder %s16_s10, %s16_s10 }
   0x5   :  { %p318_p0 = scmp.ne.s32.totalorder %s16_s10, %s317_s11  ;;  %p323_p2 = scmp.lt.s32.totalorder %s317_s11, %s317_s11 }
   0x7   :  { %p324_p3 = por %p323_p2, %p322_p1 }
   0x9   :  { %p325_p4 = pnand %p324_p3, %p318_p0 }
   0xb   :  { %328 = shalt.err (!%p325_p4)
}
   0xc   :  { %s376_s12 = smov 64   ;;  %s377_s13 = smov 4  }
   0xd   :  { %21 = dma.hbm_to_vmem [thread:$0]  %s413_s0, 256, %s16_s10, [#allocation4], %s376_s12, %s376_s12, %s377_s13  }
   0xe   :  { %s378_s16 = smov [#allocation6]  }
   0xf   :  { %s27_s17 = sshll.u32 %s378_s16, 4  ;;  %s28_s17 = int_to_ptr.vmem [resolvable:$true] %s27_s17 }
  0x10   :  { %s337_s18 = scalar_lea.vmem %s28_s17, 1024  ;;  %p342_p6 = scmp.lt.s32.totalorder %s28_s17, %s28_s17 }
  0x11   :  { %p338_p5 = scmp.ne.s32.totalorder %s28_s17, %s337_s18  ;;  %p343_p7 = scmp.lt.s32.totalorder %s337_s18, %s337_s18 }
  0x13   :  { %p344_p8 = por %p343_p7, %p342_p6 }
  0x15   :  { %p345_p9 = pnand %p344_p8, %p338_p5 }
  0x17   :  { %348 = shalt.err (!%p345_p9)
}
  0x18   :  { %33 = dma.hbm_to_vmem [thread:$0]  %s414_s1, 1024, %s28_s17, [#allocation7], %s376_s12, %s376_s12, %s377_s13  }
  0x19   :  { %369 = dma.done.wait [#allocation4], 256  }
  0x1a   :  { %370 = vsyncadd [#allocation4], 4294967040 }
  0x1b   :  { %371 = dma.done.wait [#allocation7], 1024  }
  0x1c   :  { %372 = vsyncadd [#allocation7], 4294966272  ;;  %v299_v0 = vld [vmem:[#allocation6 + $0x38] sm:$0xff]   ;;  %v300_v1 = vld [vmem:[#allocation6 + $0x30] sm:$0xff]   ;;  %s379_s0 = smov [#allocation8]  }
  0x1d   :  { %274 = vmatprep.subr.bf16.mxu0 %v299_v0  ;;  %v301_v2 = vld [vmem:[#allocation6 + $0x28] sm:$0xff]   ;;  %v302_v3 = vld [vmem:[#allocation6 + $0x20] sm:$0xff]   ;;  %v307_v4 = vld [vmem:[#allocation3] sm:$0xff]   ;;  %s222_s1 = sshll.u32 %s379_s0, 4  ;;  %s223_s1 = int_to_ptr.vmem [resolvable:$true] %s222_s1 }
  0x1e   :  { %275 = vmatpush3.bf16.msra.mxu0 %v299_v0  ;;  %290 = vmatprep.mubr.bf16.mxu0 %v307_v4  ;;  %v303_v5 = vld [vmem:[#allocation6 + $0x18] sm:$0xff]   ;;  %v304_v6 = vld [vmem:[#allocation6 + $0x10] sm:$0xff]   ;;  %v305_v7 = vld [vmem:[#allocation6 + $0x8] sm:$0xff]   ;;  %s349_s21 = scalar_lea.vmem %s223_s1, 256  ;;  %p354_p11 = scmp.lt.s32.totalorder %s223_s1, %s223_s1 }
  0x1f   :  { %276 = vmatprep.subr.bf16.mxu0 %v300_v1  ;;  %v306_v8 = vld [vmem:[#allocation6] sm:$0xff]   ;;  %v308_v9 = vld [vmem:[#allocation3 + $0x8] sm:$0xff]   ;;  %p350_p10 = scmp.ne.s32.totalorder %s223_s1, %s349_s21  ;;  %p355_p12 = scmp.lt.s32.totalorder %s349_s21, %s349_s21 }
  0x21   :  { %p356_p13 = por %p355_p12, %p354_p11 }
  0x22   :  { %277 = vmatpush3.bf16.msra.mxu0 %v300_v1 }
  0x23   :  { %278 = vmatprep.subr.bf16.mxu0 %v301_v2  ;;  %p357_p0 = pnand %p356_p13, %p350_p10 }
  0x26   :  { %279 = vmatpush3.bf16.msra.mxu0 %v301_v2 }
  0x27   :  { %280 = vmatprep.subr.bf16.mxu0 %v302_v3 }
  0x2a   :  { %281 = vmatpush3.bf16.msra.mxu0 %v302_v3 }
  0x2b   :  { %282 = vmatprep.subr.bf16.mxu0 %v303_v5 }
  0x2e   :  { %283 = vmatpush3.bf16.msra.mxu0 %v303_v5 }
  0x2f   :  { %284 = vmatprep.subr.bf16.mxu0 %v304_v6 }
  0x32   :  { %285 = vmatpush3.bf16.msra.mxu0 %v304_v6 }
  0x33   :  { %286 = vmatprep.subr.bf16.mxu0 %v305_v7 }
  0x36   :  { %287 = vmatpush3.bf16.msra.mxu0 %v305_v7 }
  0x37   :  { %288 = vmatprep.subr.bf16.mxu0 %v306_v8 }
  0x3a   :  { %289 = vmatpush3.bf16.msra.mxu0 %v306_v8 }
  0x3d   :  { %291 = vmatmul.mubr.bf16.vlgmr.msra.gmra.mxu0 %v308_v9 }
  0xfd   :  { %v292_v10 = vpop.f32.mrf.mxu0 }
  0xff   :  { %v167_v11 = vpop.f32.mrf.mxu0 }
 0x101   :  { %v293_v12 = vpop.f32.mrf.mxu0 }
 0x102   :  { %v261_v13 = vpack.c.bf16 %v293_v12, %v292_v10 }
 0x103   :  { %v170_v14 = vpop.f32.mrf.mxu0 }
 0x104   :  { %263 = vst [vmem:[#allocation8 + $0x8] sm:$0xff] %v261_v13   ;;  %v256_v15 = vpack.c.bf16 %v170_v14, %v167_v11 }
 0x106   :  { %257 = vst [vmem:[#allocation8] sm:$0xff] %v256_v15  }
 0x107   :  { %360 = shalt.err (!%p357_p0)
}
 0x108   :  { %228 = dma.vmem_to_hbm [thread:$0]  %s223_s1, 256, %s415_s2, [#allocation5], %s376_s12, %s376_s12, %s377_s13  }
 0x109   :  { %373 = dma.done.wait [#allocation5], 256  }
 0x10a   :  { %374 = vsyncadd [#allocation5], 4294967040 }
 0x10b   :  { %232 = vsyncpa [#allocation4], 1 }
 0x10c   :  { %233 = vsyncpa [#allocation7], 1 }
 0x10d   :  { %234 = vsyncpa [#allocation5], 1 }

</bundles_post_ra>
